<compile_context>
chip_gen: v6e
topology: v6e:2x2x1
jax: 0.10.0
libtpu: 0.0.40
codegen_flags: <defaults>
</compile_context>

<pallas_src>
import functools

import jax
import jax.numpy as jnp
from jax.experimental import pallas as pl
from jax.experimental.pallas import tpu as pltpu


# ----------------------------------------------------------------------------
# Kernel A: positional bias reduced to a (1, N) vector.
# ----------------------------------------------------------------------------
def _s_kernel(lhs_ref, npm_ref, s_ref):
    """s[p] = sum_k centroid[p, k], centroids = scatter-mean(pos by patch).

    lhs_ref: (2, num_nodes) f32; row 0 = per-node coordinate sum (summing the
             coordinates commutes with the scatter-mean), row 1 = ones (counts).
    npm_ref: (num_nodes, 1) int32 node -> patch map.
    s_ref:   (1, N) f32 output (lane-dense along N, ready to broadcast over kv).
    """
    num_nodes = npm_ref.shape[0]
    n = s_ref.shape[1]
    # One-hot built already in (num_nodes, N) orientation -> no `.T` / XLU transpose.
    cols = jax.lax.broadcasted_iota(jnp.int32, (num_nodes, n), 1)
    onehot = (cols == npm_ref[...]).astype(jnp.float32)                     # (num_nodes, N)
    # Single MXU pass yields both coordinate sums (row 0) and counts (row 1).
    sc = jnp.dot(lhs_ref[...], onehot, preferred_element_type=jnp.float32)  # (2, N)
    s_ref[...] = sc[0:1, :] / jnp.maximum(sc[1:2, :], 1.0)                  # empty patch -> 0


# ----------------------------------------------------------------------------
# Kernel B: LayerNorm + fused QKV projection.
# ----------------------------------------------------------------------------
def _qkv_kernel(x_ref, gamma_ref, beta_ref, w_ref, o_ref, *, eps, mm_dtype):
    x = x_ref[...]                                            # (tr, D)
    mean = jnp.mean(x, axis=-1, keepdims=True)
    var = jnp.mean((x - mean) ** 2, axis=-1, keepdims=True)   # biased var, eps in rsqrt
    normed = (x - mean) * jax.lax.rsqrt(var + eps)
    normed = normed * gamma_ref[...] + beta_ref[...]
    o_ref[...] = jnp.dot(normed.astype(mm_dtype), w_ref[...].astype(mm_dtype),
                         preferred_element_type=jnp.float32)  # (tr, 3*inner)


# ----------------------------------------------------------------------------
# Kernel C: flash attention (online softmax) + fused output projection.
# ----------------------------------------------------------------------------
def _flash_attn_kernel(s_ref, q_ref, k_ref, v_ref, wout_ref, o_ref,
                       m_sc, l_sc, acc_sc, *, heads, mm_dtype):
    ki = pl.program_id(2)

    @pl.when(ki == 0)
    def _():
        m_sc[...] = jnp.full(m_sc.shape, -jnp.inf, m_sc.dtype)
        l_sc[...] = jnp.zeros(l_sc.shape, l_sc.dtype)
        acc_sc[...] = jnp.zeros(acc_sc.shape, acc_sc.dtype)

    q = q_ref[...].astype(mm_dtype)      # (H, tq, Dh), softmax scale already folded in
    k = k_ref[...].astype(mm_dtype)      # (H, tk, Dh)
    v = v_ref[...].astype(mm_dtype)      # (H, tk, Dh)

    # Head-batched QK^T: a single leading-batch dot_general so Mosaic pipelines
    # the MXU pushes instead of H isolated tiny matmuls.
    logits = jnp.einsum("hqd,hkd->hqk", q, k,
                        preferred_element_type=jnp.float32)   # (H, tq, tk) f32
    # Additive positional bias: only the per-column -s[j] term survives softmax.
    logits = logits - s_ref[...]                              # (1, tk) broadcast

    m_prev = m_sc[...]
    m_new = jnp.maximum(m_prev, jnp.max(logits, axis=-1, keepdims=True))
    alpha = jnp.exp(m_prev - m_new)
    p = jnp.exp(logits - m_new)
    l_sc[...] = alpha * l_sc[...] + jnp.sum(p, axis=-1, keepdims=True)
    acc_sc[...] = alpha * acc_sc[...] + jnp.einsum(
        "hqk,hkd->hqd", p.astype(mm_dtype), v, preferred_element_type=jnp.float32)
    m_sc[...] = m_new

    @pl.when(ki == pl.num_programs(2) - 1)
    def _():
        # Softmax denominator on the EUP (free slot) instead of a VPU divide.
        out_h = acc_sc[...] * pl.reciprocal(l_sc[...], approx=True)   # (H, tq, Dh)
        # Concatenate heads -> (tq, inner), ONE merged output projection matmul.
        cat = jnp.concatenate([out_h[h] for h in range(heads)], axis=-1)
        o_ref[...] = jnp.dot(cat.astype(mm_dtype), wout_ref[...].astype(mm_dtype),
                             preferred_element_type=jnp.float32).astype(o_ref.dtype)


# ----------------------------------------------------------------------------
# Wrapper
# ----------------------------------------------------------------------------
def _pick_tile(n, preferred):
    return preferred if n % preferred == 0 else n


def delta_x_attn_forward(x, pos, node_patch_map, params, *, heads, dim_head,
                         mm_dtype=jnp.float32, tile=128):
    B, N, D = x.shape
    inner = heads * dim_head
    scale = dim_head ** -0.5
    num_nodes = pos.shape[0]
    tr = _pick_tile(N, tile)   # QKV row tile
    tq = _pick_tile(N, tile)   # attention q tile
    tk = _pick_tile(N, tile)   # attention kv tile

    # ---- Kernel A: (1, N) bias vector --------------------------------------
    lhs = jnp.stack([jnp.sum(pos.astype(jnp.float32), axis=-1),
                     jnp.ones((num_nodes,), jnp.float32)], axis=0)   # (2, num_nodes)
    npm2d = node_patch_map.reshape(num_nodes, 1).astype(jnp.int32)
    s = pl.pallas_call(
        _s_kernel,
        out_shape=jax.ShapeDtypeStruct((1, N), jnp.float32),
    )(lhs, npm2d)

    # ---- Kernel B: LayerNorm + QKV projection -------------------------------
    # Fold the softmax scale into the q-columns of w_qkv: O(D*inner) once on the
    # weight instead of O(B*N*inner) on activations (and never O(N^2) on logits).
    col_scale = jnp.concatenate([jnp.full((inner,), scale, jnp.float32),
                                 jnp.ones((2 * inner,), jnp.float32)])
    w_qkv_scaled = params["w_qkv"].astype(jnp.float32) * col_scale[None, :]

    qkv = pl.pallas_call(
        functools.partial(_qkv_kernel, eps=1e-5, mm_dtype=mm_dtype),
        out_shape=jax.ShapeDtypeStruct((B, N, 3 * inner), jnp.float32),
        grid_spec=pltpu.PrefetchScalarGridSpec(
            num_scalar_prefetch=0,
            grid=(B, N // tr),
            in_specs=[
                pl.BlockSpec((None, tr, D), lambda b, r: (b, r, 0)),      # x (squeezed batch)
                # grid-constant params: block index never changes -> no re-DMA.
                pl.BlockSpec((1, D), lambda b, r: (0, 0)),                # gamma
                pl.BlockSpec((1, D), lambda b, r: (0, 0)),                # beta
                pl.BlockSpec((D, 3 * inner), lambda b, r: (0, 0)),        # w_qkv (scaled)
            ],
            out_specs=pl.BlockSpec((None, tr, 3 * inner), lambda b, r: (b, r, 0)),
        ),
        compiler_params=pltpu.CompilerParams(
            dimension_semantics=("parallel", "parallel")),
    )(x, params["gamma"].reshape(1, D), params["beta"].reshape(1, D), w_qkv_scaled)

    # ---- head-major layout (pure layout plumbing, handled by XLA copy).
    # Kept in the wrapper: emitting (.., Dh) directly from a kernel would force a
    # sub-128-lane out_spec (masked partial stores), which measures far worse.
    qp, kp, vp = jnp.split(qkv, 3, axis=-1)
    to_heads = lambda t: t.reshape(B, N, heads, dim_head).transpose(0, 2, 1, 3)
    qh = to_heads(qp)                  # (B, H, N, Dh) -- scale already in w_qkv
    kh = to_heads(kp)
    vh = to_heads(vp)
    # TODO(synk): at very large N, fuse the head-major copy into kernel C's q/k/v
    # DMA via an Element-indexed BlockSpec instead of a separate HBM round-trip.

    # ---- Kernel C: flash attention + fused output projection ----------------
    out = pl.pallas_call(
        functools.partial(_flash_attn_kernel, heads=heads, mm_dtype=mm_dtype),
        out_shape=jax.ShapeDtypeStruct((B, N, D), jnp.float32),
        grid_spec=pltpu.PrefetchScalarGridSpec(
            num_scalar_prefetch=0,
            grid=(B, N // tq, N // tk),
            in_specs=[
                pl.BlockSpec((1, tk), lambda b, qi, ki: (0, ki)),                 # s (bias vec)
                pl.BlockSpec((None, heads, tq, dim_head),
                             lambda b, qi, ki: (b, 0, qi, 0)),                    # q
                pl.BlockSpec((None, heads, tk, dim_head),
                             lambda b, qi, ki: (b, 0, ki, 0)),                    # k
                pl.BlockSpec((None, heads, tk, dim_head),
                             lambda b, qi, ki: (b, 0, ki, 0)),                    # v
                pl.BlockSpec((inner, D), lambda b, qi, ki: (0, 0)),               # w_out (const)
            ],
            out_specs=pl.BlockSpec((None, tq, D), lambda b, qi, ki: (b, qi, 0)),
            scratch_shapes=[
                pltpu.VMEM((heads, tq, 1), jnp.float32),          # running max m
                pltpu.VMEM((heads, tq, 1), jnp.float32),          # running denom l
                pltpu.VMEM((heads, tq, dim_head), jnp.float32),   # running numerator
            ],
        ),
        compiler_params=pltpu.CompilerParams(
            # batch + q-tile parallel (keeps both v7x TensorCores busy even for
            # small/odd B); kv axis is the online-softmax reduction.
            dimension_semantics=("parallel", "parallel", "arbitrary")),
    )(s, qh, kh, vh, params["w_out"])
    # TODO(synk): single-buffer the grid-constant gamma/beta/w_qkv/w_out specs
    # (pl.Buffered(1) or VMEM-scratch hoist) to halve their footprint on v7x's 64 MiB.
    return out


# ----------------------------------------------------------------------------
# Pure-JAX reference matching the PyTorch module.
# ----------------------------------------------------------------------------
def ref_forward(x, pos, npm, params, *, heads, dim_head):
    B, N, D = x.shape
    inner = heads * dim_head
    mean = x.mean(-1, keepdims=True)
    var = ((x - mean) ** 2).mean(-1, keepdims=True)
    normed = (x - mean) / jnp.sqrt(var + 1e-5) * params["gamma"] + params["beta"]
    qkv = normed @ params["w_qkv"]
    q, k, v = jnp.split(qkv, 3, axis=-1)
    split_heads = lambda t: t.reshape(B, N, heads, dim_head).transpose(0, 2, 1, 3)
    q, k, v = map(split_heads, (q, k, v))
    dots = jnp.einsum("bhnd,bhmd->bhnm", q, k) * (dim_head ** -0.5)
    onehot = (npm[:, None] == jnp.arange(N)[None, :]).astype(jnp.float32)
    sums = onehot.T @ pos
    counts = onehot.sum(0)[:, None]
    centroids = sums / jnp.maximum(counts, 1.0)
    s = centroids.sum(-1)
    bias = s[:, None] - s[None, :]
    attn = jax.nn.softmax(dots + bias[None, None], axis=-1)
    out = jnp.einsum("bhnm,bhmd->bhnd", attn, v)
    out = out.transpose(0, 2, 1, 3).reshape(B, N, inner)
    return out @ params["w_out"]


if __name__ == "__main__":
    B, N, D = 2, 8, 32
    heads, dim_head = 4, 8
    inner = heads * dim_head
    num_nodes, pos_dim = 64, 3

    key = jax.random.PRNGKey(0)
    k1, k2, k3, k4, k5 = jax.random.split(key, 5)
    x = jax.random.normal(k1, (B, N, D), jnp.float32)
    pos = jax.random.normal(k2, (num_nodes, pos_dim), jnp.float32)
    node_patch_map = jax.random.randint(k3, (num_nodes,), 0, N, jnp.int32)

    params = {
        "gamma": jnp.ones((D,), jnp.float32),        # nn.LayerNorm default init
        "beta": jnp.zeros((D,), jnp.float32),
        "w_qkv": jax.random.normal(k4, (D, 3 * inner), jnp.float32) * 0.05,
        "w_out": jax.random.normal(k5, (inner, D), jnp.float32) * 0.05,
    }

    out = delta_x_attn_forward(x, pos, node_patch_map, params,
                               heads=heads, dim_head=dim_head)
    jax.block_until_ready(out)

    ref = ref_forward(x, pos, node_patch_map, params, heads=heads, dim_head=dim_head)
    assert out.shape == (B, N, D)
    # tolerance loosened slightly vs 1e-4 for the EUP approx-reciprocal softmax denom
    err = float(jnp.max(jnp.abs(out - ref)))
    assert jnp.allclose(out, ref, atol=2e-3, rtol=2e-3), err
    print("KERNEL_OK")
</pallas_src>

<mosaic_0001>
module attributes {stable_mosaic.version = 11 : i64} {
  func.func @_s_kernel(%arg0: memref<2x64xf32, #tpu.memory_space<vmem>>, %arg1: memref<64x1xi32, #tpu.memory_space<vmem>>, %arg2: memref<1x8xf32, #tpu.memory_space<vmem>>) attributes {dimension_semantics = [], scalar_prefetch = 0 : i64, scratch_operands = 0 : i64, tpu.core_type = #tpu.core_type<tc>} {
    %0 = tpu.iota {dimensions = array<i32: 1>} : vector<64x8xi32>
    %c0 = arith.constant 0 : index
    %c0_0 = arith.constant 0 : index
    %1 = vector.load %arg1[%c0, %c0_0] : memref<64x1xi32, #tpu.memory_space<vmem>>, vector<64x1xi32>
    %2 = vector.broadcast %1 : vector<64x1xi32> to vector<64x8xi32>
    %3 = arith.cmpi eq, %0, %2 : vector<64x8xi32>
    %4 = arith.extui %3 : vector<64x8xi1> to vector<64x8xi32>
    %5 = arith.sitofp %4 : vector<64x8xi32> to vector<64x8xf32>
    %c0_1 = arith.constant 0 : index
    %c0_2 = arith.constant 0 : index
    %6 = vector.load %arg0[%c0_1, %c0_2] : memref<2x64xf32, #tpu.memory_space<vmem>>, vector<2x64xf32>
    %cst = arith.constant dense<0.000000e+00> : vector<2x8xf32>
    %7 = tpu.matmul %6, %5, %cst {dimension_numbers = #tpu.dot_dimension_numbers<[1], [0], [0], [1], [0, 0, 1, 1], [], []>} : vector<2x64xf32>, vector<64x8xf32>, vector<2x8xf32> -> vector<2x8xf32>
    %8 = vector.extract_strided_slice %7 {offsets = [0, 0], sizes = [1, 8], strides = [1, 1]} : vector<2x8xf32> to vector<1x8xf32>
    %9 = vector.extract_strided_slice %7 {offsets = [1, 0], sizes = [1, 8], strides = [1, 1]} : vector<2x8xf32> to vector<1x8xf32>
    %cst_3 = arith.constant 1.000000e+00 : f32
    %10 = vector.broadcast %cst_3 : f32 to vector<1x8xf32>
    %11 = arith.maximumf %9, %10 : vector<1x8xf32>
    %12 = arith.divf %8, %11 : vector<1x8xf32>
    %c0_4 = arith.constant 0 : index
    %c0_5 = arith.constant 0 : index
    %13 = vector.load %arg2[%c0_4, %c0_5] : memref<1x8xf32, #tpu.memory_space<vmem>>, vector<1x8xf32>
    tpu.vector_store %arg2[%c0_4, %c0_5], %12 {strides = array<i32>} : memref<1x8xf32, #tpu.memory_space<vmem>>, vector<1x8xf32>,
    return
  }
}

</mosaic_0001>

<bundles_post_ra>
// kernel: tpu_custom_call.1
= control target key start
LH: loop header
LB: loop body
LE: loop exit
PB: predicated region body
PF: predicated region fallthrough
CT: control target
= control target key end

     0   :  { %v243_v2 = vmov 0   ;;  %s293_s0 = inlined_call_operand.vmem [shape: f32[2,64], index: 0, kind: input, shape index: {}]   ;;  %s294_s1 = inlined_call_operand.vmem [shape: s32[64,1], index: 1, kind: input, shape index: {}]   ;;  %s295_s2 = inlined_call_operand.hbm [shape: f32[1,8], index: 2, kind: output, shape index: {}]  }
   0x1   :  { %v21_v0 = vld [vmem:[%s294_s1 + $0x38] sm:$0xff]  ;;  %v19_v1 = vld [vmem:[%s294_s1 + $0x28] sm:$0xff]  ;;  %218 = vset.pattern.permute.xlu1 %v243_v2  ;;  %217 = vset.pattern.permute.xlu0 %v243_v2 }
   0x2   :  { %44 = vperm.xlu0 %217, %v21_v0   ;;  %38 = vperm.xlu1 %218, %v19_v1  }
   0x3   :  { %7 = vsyncpa [#allocation3], 0  ;;  %v20_v3 = vld [vmem:[%s294_s1 + $0x30] sm:$0xff]  ;;  %v18_v4 = vld [vmem:[%s294_s1 + $0x20] sm:$0xff]  ;;  %v244_v5 = vmov 0.0   ;;  %vm245_vm0 = vmmov 0   ;;  %v12_v10 = vlaneseq }
   0x4   :  { %193 = vmatprep.subr.mxu0 %v244_v5  ;;  %v17_v6 = vld [vmem:[%s294_s1 + $0x18] sm:$0xff]  ;;  %v16_v7 = vld [vmem:[%s294_s1 + $0x10] sm:$0xff]  ;;  %v15_v8 = vld [vmem:[%s294_s1 + $0x8] sm:$0xff]  ;;  %209 = vmatprep.mubr.msk.f32.mxu0 %vm245_vm0, %v244_v5  ;;  %v246_v14 = vmov 1.0   ;;  %vm71_vm8 = vcmask 523264   ;;  %s247_s26 = smov [#allocation2]  }
   0x5   :  { %v14_v9 = vld [vmem:[%s294_s1] sm:$0xff]  ;;  %v13_v11 = vand.u32 127, %v12_v10  ;;  %s159_s27 = sshll.u32 %s247_s26, 4  ;;  %vm151_vm10 = vcmask 57344   ;;  %s160_s27 = int_to_ptr.vmem [resolvable:$true] %s159_s27 }
   0x6   :  { %41 = vperm.xlu0 %217, %v20_v3   ;;  %35 = vperm.xlu1 %218, %v18_v4   ;;  %v70_v21 = vld [vmem:[%s293_s0] sm:$0x3]  ;;  %s221_s28 = scalar_lea.vmem %s160_s27, 16  ;;  %s225_s0 = scalar_lea.vmem %s160_s27, 32 }
   0x7   :  { %p222_p0 = scmp.ne.s32.totalorder %s160_s27, %s221_s28  ;;  %p226_p1 = scmp.lt.s32.totalorder %s160_s27, %s160_s27 }
   0x8   :  { %p227_p2 = scmp.lt.s32.totalorder %s225_s0, %s221_s28 }
   0xa   :  { %32 = vperm.xlu0 %217, %v17_v6   ;;  %29 = vperm.xlu1 %218, %v16_v7   ;;  %p228_p3 = por %p227_p2, %p226_p1 }
   0xc   :  { %p229_p4 = pnand %p228_p3, %p222_p0 }
   0xe   :  { %26 = vperm.xlu0 %217, %v15_v8   ;;  %23 = vperm.xlu1 %218, %v14_v9  }
  0x7d   :  { %v45_v12 = vpop.permute.xlu0 %44  ;;  %v39_v13 = vpop.permute.xlu1 %38 }
  0x7e   :  { %vm53_vm1 = vcmp.eq.s32.totalorder %v13_v11, %v45_v12  ;;  %vm51_vm3 = vcmp.eq.s32.totalorder %v13_v11, %v39_v13 }
  0x7f   :  { %194 = vmatpush3.msk.msra.mxu0 %vm53_vm1, %v246_v14 }
  0x80   :  { %195 = vmatprep.subr.mxu0 %v244_v5 }
  0x81   :  { %v42_v15 = vpop.permute.xlu0 %41  ;;  %v36_v16 = vpop.permute.xlu1 %35 }
  0x82   :  { %vm52_vm2 = vcmp.eq.s32.totalorder %v13_v11, %v42_v15  ;;  %vm50_vm4 = vcmp.eq.s32.totalorder %v13_v11, %v36_v16 }
  0x83   :  { %196 = vmatpush3.msk.msra.mxu0 %vm52_vm2, %v246_v14 }
  0x84   :  { %197 = vmatprep.subr.mxu0 %v244_v5 }
  0x85   :  { %v33_v17 = vpop.permute.xlu0 %32  ;;  %v30_v18 = vpop.permute.xlu1 %29  ;;  %198 = vmatpush3.msk.msra.mxu0 %vm51_vm3, %v246_v14 }
  0x86   :  { %199 = vmatprep.subr.mxu0 %v244_v5  ;;  %vm49_vm5 = vcmp.eq.s32.totalorder %v13_v11, %v33_v17  ;;  %vm48_vm6 = vcmp.eq.s32.totalorder %v13_v11, %v30_v18 }
  0x87   :  { %200 = vmatpush3.msk.msra.mxu0 %vm50_vm4, %v246_v14 }
  0x88   :  { %201 = vmatprep.subr.mxu0 %v244_v5 }
  0x89   :  { %v27_v19 = vpop.permute.xlu0 %26  ;;  %202 = vmatpush3.msk.msra.mxu0 %vm49_vm5, %v246_v14  ;;  %v24_v20 = vpop.permute.xlu1 %23 }
  0x8a   :  { %203 = vmatprep.subr.mxu0 %v244_v5  ;;  %vm47_vm7 = vcmp.eq.s32.totalorder %v13_v11, %v27_v19  ;;  %vm46_vm9 = vcmp.eq.s32.totalorder %v13_v11, %v24_v20 }
  0x8b   :  { %204 = vmatpush3.msk.msra.mxu0 %vm48_vm6, %v246_v14 }
  0x8c   :  { %205 = vmatprep.subr.mxu0 %v244_v5 }
  0x8d   :  { %206 = vmatpush3.msk.msra.mxu0 %vm47_vm7, %v246_v14 }
  0x8e   :  { %207 = vmatprep.subr.mxu0 %v244_v5 }
  0x8f   :  { %208 = vmatpush3.msk.msra.mxu0 %vm46_vm9, %v246_v14 }
  0x90   :  { %210 = vmatmul.mubr.msk.f32.vlgmr.msra.gmra.mxu0 %vm71_vm8, %v70_v21 }
 0x150   :  { %v141_v22 = vpop.f32.mrf.mxu0 }
 0x151   :  { %v145_v23 = vmax.f32 %v141_v22, 1.0 }
 0x152   :  { %v211_v24 = vpop.f32.mrf.mxu0 }
 0x153   :  { %v147_v25 = vrot.slane %v145_v23, 1 }
 0x155   :  { %219 = vrcp.f32 %v147_v25 }
 0x162   :  { %v220_v26 = vpop.eup %219 }
 0x163   :  { %v150_v27 = vmul.f32 %v220_v26, %v141_v22 }
 0x165   :  { %152 = vst.msk [vmem:[#allocation2] sm:$0x1] %vm151_vm10, %v150_v27 }
 0x166   :  { %232 = shalt.err (!%p229_p4)
}
 0x167   :  { %162 = dma.vmem_to_hbm [thread:$0]  %s160_s27, 16, %s295_s2, [#allocation3]  }
 0x168   :  { %241 = dma.done.wait [#allocation3], 16  }
 0x169   :  { %242 = vsyncadd [#allocation3], 4294967280 }
 0x16a   :  { %166 = vsyncpa [#allocation3], 1 }

</bundles_post_ra>
